<compile_context>
chip_gen: v6e
topology: v6e:2x2x1
jax: 0.10.0
libtpu: 0.0.40
codegen_flags: <defaults>
</compile_context>

<pallas_src>
import jax
import jax.numpy as jnp
from jax.experimental import pallas as pl
from jax.experimental.pallas import tpu as pltpu


_LANES = 128
# ~1M elements per grid step: bf16 in (2 MiB) + f32 out (4 MiB) = 6 MiB/step,
# 12 MiB double-buffered -> fits every generation's scoped VMEM default.
_TARGET_BLOCK_ELEMS = 8192 * _LANES


def _conditioner_kernel(x_ref, o_ref):
    # Pass-through conditioning: identity on the features, cast to float32.
    o_ref[...] = x_ref[...].astype(o_ref.dtype)


def _round_up(x, m):
    return ((x + m - 1) // m) * m


class Conditioner:
    """JAX/Pallas mirror of the abstract PyTorch Conditioner base class."""

    def __init__(self, cfg):
        self.cfg = cfg

    def forward(self, cond):
        orig_shape = cond.shape
        n = 1
        for d in orig_shape:
            n *= int(d)

        # Empty tensor: nothing to do.
        if n == 0:
            return jnp.zeros(orig_shape, jnp.float32), None

        # Pick a lane-dense (rows, cols) view with NO padding.
        if len(orig_shape) >= 1 and orig_shape[-1] % _LANES == 0:
            cols = int(orig_shape[-1])
            rows = n // cols
        elif n % _LANES == 0:
            cols = _LANES
            rows = n // _LANES
        else:
            # TODO(synk): ragged element count (n % 128 != 0) — XLA's fused
            # convert is already HBM-roofline for identity+cast, so bypass the
            # custom call instead of paying pad/slice copies.
            return cond.astype(jnp.float32), None

        x2d = cond.reshape(rows, cols)

        # Tile selection: big blocks to amortize per-step overhead, but >= 2
        # blocks when the slab is large enough so both v7x TensorCores get work.
        max_tile_rows = max(8, (_TARGET_BLOCK_ELEMS // cols) // 8 * 8)
        if rows <= 16:
            tile_rows = rows  # full-extent block (satisfies the (8,128) rule)
        else:
            tile_rows = min(max_tile_rows, _round_up((rows + 1) // 2, 8))
            tile_rows = min(tile_rows, rows)

        grid = (pl.cdiv(rows, tile_rows),)

        itemsize = jnp.dtype(cond.dtype).itemsize
        in_bytes = rows * cols * itemsize
        out_bytes = rows * cols * 4  # float32 output

        out2d = pl.pallas_call(
            _conditioner_kernel,
            out_shape=jax.ShapeDtypeStruct((rows, cols), jnp.float32),
            grid_spec=pltpu.PrefetchScalarGridSpec(
                num_scalar_prefetch=0,
                grid=grid,
                in_specs=[pl.BlockSpec((tile_rows, cols), lambda r: (r, 0))],
                out_specs=pl.BlockSpec((tile_rows, cols), lambda r: (r, 0)),
            ),
            compiler_params=pltpu.CompilerParams(
                dimension_semantics=("parallel",),
                vmem_limit_bytes=32 * 1024 * 1024,
            ),
            cost_estimate=pl.CostEstimate(
                flops=0,
                transcendentals=0,
                bytes_accessed=int(in_bytes + out_bytes),
            ),
        )(x2d)

        out = out2d.reshape(orig_shape)
        # Second element of the PyTorch return tuple is a PIL Image — no
        # tensor equivalent exists; return None in its place.
        return out, None

    def __call__(self, cond):
        return self.forward(cond)


if __name__ == "__main__":
    key = jax.random.PRNGKey(0)
    model = Conditioner(cfg={"hidden_size": 32})

    # Primary case consistent with a conditioning tensor: [B, S, H].
    B, S, H = 2, 8, 32
    cond = jax.random.normal(key, (B, S, H), dtype=jnp.bfloat16)
    out, _img = model(cond)
    out = jax.block_until_ready(out)
    assert out.shape == (B, S, H)
    assert out.dtype == jnp.float32
    assert jnp.allclose(out, cond.astype(jnp.float32))

    # Secondary case exercising the multi-block lane-dense path (last dim
    # already a multiple of 128, rows > 16 -> grid of >= 2 blocks).
    key2 = jax.random.PRNGKey(0)
    cond2 = jax.random.normal(key2, (4, 48, 128), dtype=jnp.bfloat16)
    out2, _ = model(cond2)
    out2 = jax.block_until_ready(out2)
    assert out2.shape == (4, 48, 128)
    assert out2.dtype == jnp.float32
    assert jnp.allclose(out2, cond2.astype(jnp.float32))

    print("KERNEL_OK")
</pallas_src>

<mosaic_0001>
module attributes {stable_mosaic.version = 11 : i64} {
  func.func @_conditioner_kernel(%arg0: i32, %arg1: memref<4x128xbf16, #tpu.memory_space<vmem>>, %arg2: memref<4x128xf32, #tpu.memory_space<vmem>>) attributes {dimension_semantics = [#tpu.dimension_semantics<parallel>], iteration_bounds = array<i64: 1>, scalar_prefetch = 0 : i64, scratch_operands = 0 : i64, tpu.core_type = #tpu.core_type<tc>, window_params = [{transform_indices = @transform_0, window_bounds = array<i64: 4, 128>}, {transform_indices = @transform_1, window_bounds = array<i64: 4, 128>}]} {
    %c0 = arith.constant 0 : index
    %c0_0 = arith.constant 0 : index
    %0 = vector.load %arg1[%c0, %c0_0] : memref<4x128xbf16, #tpu.memory_space<vmem>>, vector<4x128xbf16>
    %1 = arith.extf %0 : vector<4x128xbf16> to vector<4x128xf32>
    %c0_1 = arith.constant 0 : index
    %c0_2 = arith.constant 0 : index
    %2 = vector.load %arg2[%c0_1, %c0_2] : memref<4x128xf32, #tpu.memory_space<vmem>>, vector<4x128xf32>
    tpu.vector_store %arg2[%c0_1, %c0_2], %1 {strides = array<i32>} : memref<4x128xf32, #tpu.memory_space<vmem>>, vector<4x128xf32>,
    return
  }
  func.func @transform_0(%arg0: i32) -> (i32, i32) {
    %c0_i32 = arith.constant 0 : i32
    %c0_i32_0 = arith.constant 0 : i32
    return %arg0, %c0_i32 : i32, i32
  }
  func.func @transform_1(%arg0: i32) -> (i32, i32) {
    %c0_i32 = arith.constant 0 : i32
    %c0_i32_0 = arith.constant 0 : i32
    return %arg0, %c0_i32 : i32, i32
  }
}

</mosaic_0001>

<bundles_post_ra>
// kernel: tpu_custom_call.1
= control target key start
LH: loop header
LB: loop body
LE: loop exit
PB: predicated region body
PF: predicated region fallthrough
CT: control target
= control target key end

     0   :  { %6 = vsyncpa [#allocation3], 0  ;;  %s103_s0 = inlined_call_operand.hbm [shape: bf16[4,128], index: 0, kind: input, shape index: {}]   ;;  %s104_s1 = inlined_call_operand.hbm [shape: f32[4,128], index: 1, kind: output, shape index: {}]  }
   0x1   :  { %7 = vsyncpa [#allocation4], 0  ;;  %s85_s6 = smov [#allocation2]  }
   0x2   :  { %s14_s7 = sshll.u32 %s85_s6, 4  ;;  %s15_s7 = int_to_ptr.vmem [resolvable:$true] %s14_s7 }
   0x3   :  { %s49_s8 = scalar_lea.vmem %s15_s7, 32  ;;  %p54_p1 = scmp.lt.s32.totalorder %s15_s7, %s15_s7 }
   0x4   :  { %p50_p0 = scmp.ne.s32.totalorder %s15_s7, %s49_s8  ;;  %p55_p2 = scmp.lt.s32.totalorder %s49_s8, %s49_s8 }
   0x6   :  { %p56_p3 = por %p55_p2, %p54_p1 }
   0x8   :  { %p57_p4 = pnand %p56_p3, %p50_p0 }
   0xa   :  { %60 = shalt.err (!%p57_p4)
}
   0xb   :  { %17 = dma.hbm_to_vmem [thread:$0]  %s103_s0, 32, %s15_s7, [#allocation3]  }
   0xc   :  { %81 = dma.done.wait [#allocation3], 32  }
   0xd   :  { %82 = vsyncadd [#allocation3], 4294967264  ;;  %s86_s11 = smov [#allocation5]   ;;  %v21_v0 = vld [vmem:[#allocation2] sm:$0x3] }
   0xe   :  { %s30_s12 = sshll.u32 %s86_s11, 4  ;;  %v22_v1 = vunpack.c.l.bf16 %v21_v0  ;;  %s31_s12 = int_to_ptr.vmem [resolvable:$true] %s30_s12 }
   0xf   :  { %s61_s13 = scalar_lea.vmem %s31_s12, 64  ;;  %p66_p6 = scmp.lt.s32.totalorder %s31_s12, %s31_s12 }
  0x10   :  { %23 = vst [vmem:[#allocation5] sm:$0xf] %v22_v1  ;;  %p62_p5 = scmp.ne.s32.totalorder %s31_s12, %s61_s13  ;;  %p67_p7 = scmp.lt.s32.totalorder %s61_s13, %s61_s13 }
  0x12   :  { %p68_p8 = por %p67_p7, %p66_p6 }
  0x14   :  { %p69_p9 = pnand %p68_p8, %p62_p5 }
  0x16   :  { %72 = shalt.err (!%p69_p9)
}
  0x17   :  { %33 = dma.vmem_to_hbm [thread:$0]  %s31_s12, 64, %s104_s1, [#allocation4]  }
  0x18   :  { %83 = dma.done.wait [#allocation4], 64  }
  0x19   :  { %84 = vsyncadd [#allocation4], 4294967232 }
  0x1a   :  { %37 = vsyncpa [#allocation3], 1 }
  0x1b   :  { %38 = vsyncpa [#allocation4], 1 }

</bundles_post_ra>
